<compile_context>
chip_gen: v7x
topology: tpu7x:2x2x1
jax: 0.10.0
libtpu: 0.0.40
codegen_flags: <defaults>
</compile_context>

<pallas_src>
import functools

import jax
import jax.numpy as jnp
from jax.experimental import pallas as pl
from jax.experimental.pallas import tpu as pltpu


def _conv_relu_kernel(xf_ref, w_ref, b_ref, o_ref, *, kh, kw, w_pad, w_out,
                      h_out):
    """One grid step: a block of images -> relu(W @ im2col(x) + b), dense out.

    xf_ref: (B_blk, Cin_pad, Lflat)    flattened zero-padded images
    w_ref : (Cout, K)                  K = KH*KW*Cin_pad, k = (i*KW+j)*Cin_pad+c
    b_ref : (Cout, 1)                  bias (lane-broadcast)
    o_ref : (B_blk, Cout, H_out*W_out) dense output (no padded-width garbage)
    """
    b_blk = xf_ref.shape[0]
    m = h_out * w_pad                       # matmul columns per image (wrapped)

    w = w_ref[...]                          # resident across grid steps
    bias = b_ref[...].astype(jnp.float32)

    for b in range(b_blk):
        xb = xf_ref[b]                      # (Cin_pad, Lflat)

        # im2col in vregs (no scratch): every tap is a contiguous static lane
        # slice of the flat image — element (h+i, w+j) of the padded image
        # lives at flat offset (h*W_pad + w) + (i*W_pad + j).  Cin_pad is a
        # full sublane slab, so the axis-0 concat is tile-aligned.
        taps = [xb[:, i * w_pad + j:i * w_pad + j + m]
                for i in range(kh) for j in range(kw)]
        p = taps[0] if len(taps) == 1 else jnp.concatenate(taps, axis=0)

        # Single MXU matmul per image, f32 accumulation, + bias + ReLU.
        acc = jnp.dot(w, p, preferred_element_type=jnp.float32)   # (Cout, M)
        acc = jnp.maximum(acc + bias, 0.0).astype(o_ref.dtype)

        # Compact away padded-width garbage columns (w >= W_out): per output
        # row, store the valid (Cout, W_out) lane window into the dense block.
        for hh in range(h_out):
            o_ref[b, :, hh * w_out:(hh + 1) * w_out] = (
                acc[:, hh * w_pad:hh * w_pad + w_out])


def _choose_images_per_block(n, per_image_bytes, max_block_bytes=4 * 1024 * 1024):
    """Largest divisor of n that keeps >= 2 grid steps when n >= 2 (so both
    v7x TensorCores get work) and keeps the per-step working set modest."""
    best = 1
    for d in range(1, n + 1):
        if n % d:
            continue
        if n >= 2 and n // d < 2:
            continue
        if d * per_image_bytes > max_block_bytes:
            continue
        best = d
    return best


def conv2d_block_pallas(x_nchw, weight_oihw, bias, *, stride=1, padding=0,
                        use_bf16_matmul=False, images_per_block=None):
    """Forward of Conv2dBlock: relu(conv2d(x, W, b)). NCHW in, NCHW out."""
    assert stride == 1, "kernel implements stride=1 (module default)"
    n, c_in, h, w = x_nchw.shape
    c_out, c_in_w, kh, kw = weight_oihw.shape
    assert c_in == c_in_w

    h_pad, w_pad = h + 2 * padding, w + 2 * padding
    h_out, w_out = h_pad - kh + 1, w_pad - kw + 1
    m_mm = h_out * w_pad                 # matmul columns per image (wrapped)
    m_dense = h_out * w_out              # dense output columns per image
    l_flat = (h_pad + 1) * w_pad         # +1 zero slack row keeps the last
                                         # tap window in bounds (stride=1 only)

    # MXU operand dtype (bf16 fast path on v5e/v6e/v7x); casts hoisted here so
    # there are no per-step VPU casts inside the kernel.
    op_dtype = jnp.bfloat16 if use_bf16_matmul else x_nchw.dtype
    pack = 8 * max(1, 4 // jnp.dtype(op_dtype).itemsize)   # full sublane slab
    c_in_pad = ((c_in + pack - 1) // pack) * pack
    k_dim = kh * kw * c_in_pad

    # One pad op: zero channel padding + spatial zero padding + slack row,
    # then a free contiguous reshape to flat spatial (input stays NCHW-major).
    xp = jnp.pad(x_nchw, ((0, 0), (0, c_in_pad - c_in),
                          (padding, padding + 1), (padding, padding)))
    xf = xp.reshape(n, c_in_pad, l_flat).astype(op_dtype)

    # Weights -> (Cout, K) with k = (i*KW + j)*Cin_pad + c (zero columns for
    # padded channels); bias -> (Cout, 1) f32.
    w2 = jnp.pad(weight_oihw, ((0, 0), (0, c_in_pad - c_in), (0, 0), (0, 0)))
    w2 = jnp.transpose(w2, (0, 2, 3, 1)).reshape(c_out, k_dim).astype(op_dtype)
    b2 = bias.reshape(c_out, 1).astype(jnp.float32)

    # Images per grid step: amortize per-step overhead, keep >= 2 parallel
    # steps for v7x's two TensorCores, bound the per-step working set.
    per_image_bytes = (c_in_pad * l_flat * xf.dtype.itemsize      # input
                       + k_dim * m_mm * 4                         # im2col P
                       + c_out * m_mm * 4                         # acc
                       + c_out * m_dense * x_nchw.dtype.itemsize)  # output
    b_blk = images_per_block or _choose_images_per_block(n, per_image_bytes)
    assert n % b_blk == 0, "images_per_block must divide batch size"
    grid = (n // b_blk,)

    # VMEM budget from the actual block sizes (double-buffered I/O + compute
    # temporaries), generous floor, capped at v7x's 64 MiB physical VMEM.
    io_bytes = (b_blk * c_in_pad * l_flat * xf.dtype.itemsize
                + c_out * k_dim * w2.dtype.itemsize + c_out * 4
                + b_blk * c_out * m_dense * x_nchw.dtype.itemsize)
    vmem_limit = int(min(max(2 * io_bytes + 6 * b_blk * k_dim * m_mm * 4
                             + (2 << 20), 16 << 20), 64 << 20))

    kernel = functools.partial(_conv_relu_kernel, kh=kh, kw=kw, w_pad=w_pad,
                               w_out=w_out, h_out=h_out)

    out_flat = pl.pallas_call(
        kernel,
        out_shape=jax.ShapeDtypeStruct((n, c_out, m_dense), x_nchw.dtype),
        grid_spec=pltpu.PrefetchScalarGridSpec(
            num_scalar_prefetch=0,
            grid=grid,
            in_specs=[
                pl.BlockSpec((b_blk, c_in_pad, l_flat), lambda g: (g, 0, 0)),
                pl.BlockSpec((c_out, k_dim), lambda g: (0, 0)),
                pl.BlockSpec((c_out, 1), lambda g: (0, 0)),
            ],
            out_specs=pl.BlockSpec((b_blk, c_out, m_dense),
                                   lambda g: (g, 0, 0)),
        ),
        compiler_params=pltpu.CompilerParams(
            dimension_semantics=("parallel",),
            vmem_limit_bytes=vmem_limit,
        ),
    )(xf, w2, b2)

    # Dense already — contiguous (free) reshape back to NCHW, no slice pass.
    return out_flat.reshape(n, c_out, h_out, w_out)


def init_conv2d_block_params(key, in_channels, out_channels, kernel_size):
    """Deterministic kaiming_uniform (relu gain) weights, zero bias."""
    fan_in = in_channels * kernel_size * kernel_size
    gain = jnp.sqrt(2.0)                       # nonlinearity='relu'
    bound = gain * jnp.sqrt(3.0 / fan_in)
    weight = jax.random.uniform(
        key, (out_channels, in_channels, kernel_size, kernel_size),
        minval=-bound, maxval=bound, dtype=jnp.float32)
    bias = jnp.zeros((out_channels,), jnp.float32)
    return weight, bias


if __name__ == "__main__":
    key = jax.random.PRNGKey(0)
    k_x, k_w = jax.random.split(key)

    # Small shapes consistent with the module.
    batch, in_ch, out_ch, spatial, ksize, pad = 2, 4, 8, 16, 3, 1

    x = jax.random.normal(k_x, (batch, in_ch, spatial, spatial), jnp.float32)
    weight, bias = init_conv2d_block_params(k_w, in_ch, out_ch, ksize)

    fwd = jax.jit(functools.partial(conv2d_block_pallas, stride=1, padding=pad))
    out = jax.block_until_ready(fwd(x, weight, bias))

    # Reference check (plain JAX conv + relu), same NCHW/OIHW semantics.
    ref = jax.lax.conv_general_dilated(
        x, weight, window_strides=(1, 1), padding=[(pad, pad), (pad, pad)],
        dimension_numbers=("NCHW", "OIHW", "NCHW"))
    ref = jnp.maximum(ref + bias[None, :, None, None], 0.0)

    assert out.shape == (batch, out_ch, spatial, spatial)
    assert jnp.allclose(out, ref, atol=1e-4, rtol=1e-4)
    print("KERNEL_OK")
</pallas_src>

<mosaic_0001>
module attributes {stable_mosaic.version = 11 : i64} {
  func.func @_conv_relu_kernel(%arg0: i32, %arg1: memref<1x8x342xf32, #tpu.memory_space<vmem>>, %arg2: memref<8x72xf32, #tpu.memory_space<vmem>>, %arg3: memref<8x1xf32, #tpu.memory_space<vmem>>, %arg4: memref<1x8x256xf32, #tpu.memory_space<vmem>>) attributes {dimension_semantics = [#tpu.dimension_semantics<parallel>], iteration_bounds = array<i64: 2>, scalar_prefetch = 0 : i64, scratch_operands = 0 : i64, tpu.core_type = #tpu.core_type<tc>, window_params = [{transform_indices = @transform_0, window_bounds = array<i64: 1, 8, 342>}, {pipeline_mode = #tpu.pipeline_mode<synchronous>, transform_indices = @transform_1, window_bounds = array<i64: 8, 72>}, {pipeline_mode = #tpu.pipeline_mode<synchronous>, transform_indices = @transform_2, window_bounds = array<i64: 8, 1>}, {transform_indices = @transform_3, window_bounds = array<i64: 1, 8, 256>}]} {
    %c0 = arith.constant 0 : index
    %c0_0 = arith.constant 0 : index
    %0 = vector.load %arg2[%c0, %c0_0] : memref<8x72xf32, #tpu.memory_space<vmem>>, vector<8x72xf32>
    %c0_1 = arith.constant 0 : index
    %c0_2 = arith.constant 0 : index
    %1 = vector.load %arg3[%c0_1, %c0_2] : memref<8x1xf32, #tpu.memory_space<vmem>>, vector<8x1xf32>
    %c0_3 = arith.constant 0 : index
    %c0_4 = arith.constant 0 : index
    %c0_5 = arith.constant 0 : index
    %2 = vector.load %arg1[%c0_3, %c0_4, %c0_5] : memref<1x8x342xf32, #tpu.memory_space<vmem>>, vector<1x8x342xf32>
    %3 = vector.shape_cast %2 : vector<1x8x342xf32> to vector<8x342xf32>
    %4 = vector.extract_strided_slice %3 {offsets = [0, 0], sizes = [8, 288], strides = [1, 1]} : vector<8x342xf32> to vector<8x288xf32>
    %5 = vector.extract_strided_slice %3 {offsets = [0, 1], sizes = [8, 288], strides = [1, 1]} : vector<8x342xf32> to vector<8x288xf32>
    %6 = vector.extract_strided_slice %3 {offsets = [0, 2], sizes = [8, 288], strides = [1, 1]} : vector<8x342xf32> to vector<8x288xf32>
    %7 = vector.extract_strided_slice %3 {offsets = [0, 18], sizes = [8, 288], strides = [1, 1]} : vector<8x342xf32> to vector<8x288xf32>
    %8 = vector.extract_strided_slice %3 {offsets = [0, 19], sizes = [8, 288], strides = [1, 1]} : vector<8x342xf32> to vector<8x288xf32>
    %9 = vector.extract_strided_slice %3 {offsets = [0, 20], sizes = [8, 288], strides = [1, 1]} : vector<8x342xf32> to vector<8x288xf32>
    %10 = vector.extract_strided_slice %3 {offsets = [0, 36], sizes = [8, 288], strides = [1, 1]} : vector<8x342xf32> to vector<8x288xf32>
    %11 = vector.extract_strided_slice %3 {offsets = [0, 37], sizes = [8, 288], strides = [1, 1]} : vector<8x342xf32> to vector<8x288xf32>
    %12 = vector.extract_strided_slice %3 {offsets = [0, 38], sizes = [8, 288], strides = [1, 1]} : vector<8x342xf32> to vector<8x288xf32>
    %13 = tpu.concatenate %4, %5, %6, %7, %8, %9, %10, %11, %12 in 0 : vector<8x288xf32>, vector<8x288xf32>, vector<8x288xf32>, vector<8x288xf32>, vector<8x288xf32>, vector<8x288xf32>, vector<8x288xf32>, vector<8x288xf32>, vector<8x288xf32> -> vector<72x288xf32>
    %cst = arith.constant dense<0.000000e+00> : vector<8x288xf32>
    %14 = tpu.matmul %0, %13, %cst {dimension_numbers = #tpu.dot_dimension_numbers<[1], [0], [0], [1], [0, 0, 1, 1], [], []>} : vector<8x72xf32>, vector<72x288xf32>, vector<8x288xf32> -> vector<8x288xf32>
    %15 = vector.broadcast %1 : vector<8x1xf32> to vector<8x288xf32>
    %16 = arith.addf %14, %15 : vector<8x288xf32>
    %cst_6 = arith.constant 0.000000e+00 : f32
    %17 = vector.broadcast %cst_6 : f32 to vector<8x288xf32>
    %18 = arith.maximumf %16, %17 : vector<8x288xf32>
    %19 = vector.extract_strided_slice %18 {offsets = [0, 0], sizes = [8, 16], strides = [1, 1]} : vector<8x288xf32> to vector<8x16xf32>
    %c0_7 = arith.constant 0 : index
    %c0_8 = arith.constant 0 : index
    %c0_9 = arith.constant 0 : index
    %20 = vector.load %arg4[%c0_7, %c0_8, %c0_9] : memref<1x8x256xf32, #tpu.memory_space<vmem>>, vector<1x8x16xf32>
    %21 = vector.shape_cast %20 : vector<1x8x16xf32> to vector<8x16xf32>
    %22 = vector.shape_cast %19 : vector<8x16xf32> to vector<1x8x16xf32>
    tpu.vector_store %arg4[%c0_7, %c0_8, %c0_9], %22 {strides = array<i32>} : memref<1x8x256xf32, #tpu.memory_space<vmem>>, vector<1x8x16xf32>,
    %23 = vector.extract_strided_slice %18 {offsets = [0, 18], sizes = [8, 16], strides = [1, 1]} : vector<8x288xf32> to vector<8x16xf32>
    %c0_10 = arith.constant 0 : index
    %c0_11 = arith.constant 0 : index
    %c16 = arith.constant 16 : index
    %24 = vector.load %arg4[%c0_10, %c0_11, %c16] : memref<1x8x256xf32, #tpu.memory_space<vmem>>, vector<1x8x16xf32>
    %25 = vector.shape_cast %24 : vector<1x8x16xf32> to vector<8x16xf32>
    %26 = vector.shape_cast %23 : vector<8x16xf32> to vector<1x8x16xf32>
    tpu.vector_store %arg4[%c0_10, %c0_11, %c16], %26 {strides = array<i32>} : memref<1x8x256xf32, #tpu.memory_space<vmem>>, vector<1x8x16xf32>,
    %27 = vector.extract_strided_slice %18 {offsets = [0, 36], sizes = [8, 16], strides = [1, 1]} : vector<8x288xf32> to vector<8x16xf32>
    %c0_12 = arith.constant 0 : index
    %c0_13 = arith.constant 0 : index
    %c32 = arith.constant 32 : index
    %28 = vector.load %arg4[%c0_12, %c0_13, %c32] : memref<1x8x256xf32, #tpu.memory_space<vmem>>, vector<1x8x16xf32>
    %29 = vector.shape_cast %28 : vector<1x8x16xf32> to vector<8x16xf32>
    %30 = vector.shape_cast %27 : vector<8x16xf32> to vector<1x8x16xf32>
    tpu.vector_store %arg4[%c0_12, %c0_13, %c32], %30 {strides = array<i32>} : memref<1x8x256xf32, #tpu.memory_space<vmem>>, vector<1x8x16xf32>,
    %31 = vector.extract_strided_slice %18 {offsets = [0, 54], sizes = [8, 16], strides = [1, 1]} : vector<8x288xf32> to vector<8x16xf32>
    %c0_14 = arith.constant 0 : index
    %c0_15 = arith.constant 0 : index
    %c48 = arith.constant 48 : index
    %32 = vector.load %arg4[%c0_14, %c0_15, %c48] : memref<1x8x256xf32, #tpu.memory_space<vmem>>, vector<1x8x16xf32>
    %33 = vector.shape_cast %32 : vector<1x8x16xf32> to vector<8x16xf32>
    %34 = vector.shape_cast %31 : vector<8x16xf32> to vector<1x8x16xf32>
    tpu.vector_store %arg4[%c0_14, %c0_15, %c48], %34 {strides = array<i32>} : memref<1x8x256xf32, #tpu.memory_space<vmem>>, vector<1x8x16xf32>,
    %35 = vector.extract_strided_slice %18 {offsets = [0, 72], sizes = [8, 16], strides = [1, 1]} : vector<8x288xf32> to vector<8x16xf32>
    %c0_16 = arith.constant 0 : index
    %c0_17 = arith.constant 0 : index
    %c64 = arith.constant 64 : index
    %36 = vector.load %arg4[%c0_16, %c0_17, %c64] : memref<1x8x256xf32, #tpu.memory_space<vmem>>, vector<1x8x16xf32>
    %37 = vector.shape_cast %36 : vector<1x8x16xf32> to vector<8x16xf32>
    %38 = vector.shape_cast %35 : vector<8x16xf32> to vector<1x8x16xf32>
    tpu.vector_store %arg4[%c0_16, %c0_17, %c64], %38 {strides = array<i32>} : memref<1x8x256xf32, #tpu.memory_space<vmem>>, vector<1x8x16xf32>,
    %39 = vector.extract_strided_slice %18 {offsets = [0, 90], sizes = [8, 16], strides = [1, 1]} : vector<8x288xf32> to vector<8x16xf32>
    %c0_18 = arith.constant 0 : index
    %c0_19 = arith.constant 0 : index
    %c80 = arith.constant 80 : index
    %40 = vector.load %arg4[%c0_18, %c0_19, %c80] : memref<1x8x256xf32, #tpu.memory_space<vmem>>, vector<1x8x16xf32>
    %41 = vector.shape_cast %40 : vector<1x8x16xf32> to vector<8x16xf32>
    %42 = vector.shape_cast %39 : vector<8x16xf32> to vector<1x8x16xf32>
    tpu.vector_store %arg4[%c0_18, %c0_19, %c80], %42 {strides = array<i32>} : memref<1x8x256xf32, #tpu.memory_space<vmem>>, vector<1x8x16xf32>,
    %43 = vector.extract_strided_slice %18 {offsets = [0, 108], sizes = [8, 16], strides = [1, 1]} : vector<8x288xf32> to vector<8x16xf32>
    %c0_20 = arith.constant 0 : index
    %c0_21 = arith.constant 0 : index
    %c96 = arith.constant 96 : index
    %44 = vector.load %arg4[%c0_20, %c0_21, %c96] : memref<1x8x256xf32, #tpu.memory_space<vmem>>, vector<1x8x16xf32>
    %45 = vector.shape_cast %44 : vector<1x8x16xf32> to vector<8x16xf32>
    %46 = vector.shape_cast %43 : vector<8x16xf32> to vector<1x8x16xf32>
    tpu.vector_store %arg4[%c0_20, %c0_21, %c96], %46 {strides = array<i32>} : memref<1x8x256xf32, #tpu.memory_space<vmem>>, vector<1x8x16xf32>,
    %47 = vector.extract_strided_slice %18 {offsets = [0, 126], sizes = [8, 16], strides = [1, 1]} : vector<8x288xf32> to vector<8x16xf32>
    %c0_22 = arith.constant 0 : index
    %c0_23 = arith.constant 0 : index
    %c112 = arith.constant 112 : index
    %48 = vector.load %arg4[%c0_22, %c0_23, %c112] : memref<1x8x256xf32, #tpu.memory_space<vmem>>, vector<1x8x16xf32>
    %49 = vector.shape_cast %48 : vector<1x8x16xf32> to vector<8x16xf32>
    %50 = vector.shape_cast %47 : vector<8x16xf32> to vector<1x8x16xf32>
    tpu.vector_store %arg4[%c0_22, %c0_23, %c112], %50 {strides = array<i32>} : memref<1x8x256xf32, #tpu.memory_space<vmem>>, vector<1x8x16xf32>,
    %51 = vector.extract_strided_slice %18 {offsets = [0, 144], sizes = [8, 16], strides = [1, 1]} : vector<8x288xf32> to vector<8x16xf32>
    %c0_24 = arith.constant 0 : index
    %c0_25 = arith.constant 0 : index
    %c128 = arith.constant 128 : index
    %52 = vector.load %arg4[%c0_24, %c0_25, %c128] : memref<1x8x256xf32, #tpu.memory_space<vmem>>, vector<1x8x16xf32>
    %53 = vector.shape_cast %52 : vector<1x8x16xf32> to vector<8x16xf32>
    %54 = vector.shape_cast %51 : vector<8x16xf32> to vector<1x8x16xf32>
    tpu.vector_store %arg4[%c0_24, %c0_25, %c128], %54 {strides = array<i32>} : memref<1x8x256xf32, #tpu.memory_space<vmem>>, vector<1x8x16xf32>,
    %55 = vector.extract_strided_slice %18 {offsets = [0, 162], sizes = [8, 16], strides = [1, 1]} : vector<8x288xf32> to vector<8x16xf32>
    %c0_26 = arith.constant 0 : index
    %c0_27 = arith.constant 0 : index
    %c144 = arith.constant 144 : index
    %56 = vector.load %arg4[%c0_26, %c0_27, %c144] : memref<1x8x256xf32, #tpu.memory_space<vmem>>, vector<1x8x16xf32>
    %57 = vector.shape_cast %56 : vector<1x8x16xf32> to vector<8x16xf32>
    %58 = vector.shape_cast %55 : vector<8x16xf32> to vector<1x8x16xf32>
    tpu.vector_store %arg4[%c0_26, %c0_27, %c144], %58 {strides = array<i32>} : memref<1x8x256xf32, #tpu.memory_space<vmem>>, vector<1x8x16xf32>,
    %59 = vector.extract_strided_slice %18 {offsets = [0, 180], sizes = [8, 16], strides = [1, 1]} : vector<8x288xf32> to vector<8x16xf32>
    %c0_28 = arith.constant 0 : index
    %c0_29 = arith.constant 0 : index
    %c160 = arith.constant 160 : index
    %60 = vector.load %arg4[%c0_28, %c0_29, %c160] : memref<1x8x256xf32, #tpu.memory_space<vmem>>, vector<1x8x16xf32>
    %61 = vector.shape_cast %60 : vector<1x8x16xf32> to vector<8x16xf32>
    %62 = vector.shape_cast %59 : vector<8x16xf32> to vector<1x8x16xf32>
    tpu.vector_store %arg4[%c0_28, %c0_29, %c160], %62 {strides = array<i32>} : memref<1x8x256xf32, #tpu.memory_space<vmem>>, vector<1x8x16xf32>,
    %63 = vector.extract_strided_slice %18 {offsets = [0, 198], sizes = [8, 16], strides = [1, 1]} : vector<8x288xf32> to vector<8x16xf32>
    %c0_30 = arith.constant 0 : index
    %c0_31 = arith.constant 0 : index
    %c176 = arith.constant 176 : index
    %64 = vector.load %arg4[%c0_30, %c0_31, %c176] : memref<1x8x256xf32, #tpu.memory_space<vmem>>, vector<1x8x16xf32>
    %65 = vector.shape_cast %64 : vector<1x8x16xf32> to vector<8x16xf32>
    %66 = vector.shape_cast %63 : vector<8x16xf32> to vector<1x8x16xf32>
    tpu.vector_store %arg4[%c0_30, %c0_31, %c176], %66 {strides = array<i32>} : memref<1x8x256xf32, #tpu.memory_space<vmem>>, vector<1x8x16xf32>,
    %67 = vector.extract_strided_slice %18 {offsets = [0, 216], sizes = [8, 16], strides = [1, 1]} : vector<8x288xf32> to vector<8x16xf32>
    %c0_32 = arith.constant 0 : index
    %c0_33 = arith.constant 0 : index
    %c192 = arith.constant 192 : index
    %68 = vector.load %arg4[%c0_32, %c0_33, %c192] : memref<1x8x256xf32, #tpu.memory_space<vmem>>, vector<1x8x16xf32>
    %69 = vector.shape_cast %68 : vector<1x8x16xf32> to vector<8x16xf32>
    %70 = vector.shape_cast %67 : vector<8x16xf32> to vector<1x8x16xf32>
    tpu.vector_store %arg4[%c0_32, %c0_33, %c192], %70 {strides = array<i32>} : memref<1x8x256xf32, #tpu.memory_space<vmem>>, vector<1x8x16xf32>,
    %71 = vector.extract_strided_slice %18 {offsets = [0, 234], sizes = [8, 16], strides = [1, 1]} : vector<8x288xf32> to vector<8x16xf32>
    %c0_34 = arith.constant 0 : index
    %c0_35 = arith.constant 0 : index
    %c208 = arith.constant 208 : index
    %72 = vector.load %arg4[%c0_34, %c0_35, %c208] : memref<1x8x256xf32, #tpu.memory_space<vmem>>, vector<1x8x16xf32>
    %73 = vector.shape_cast %72 : vector<1x8x16xf32> to vector<8x16xf32>
    %74 = vector.shape_cast %71 : vector<8x16xf32> to vector<1x8x16xf32>
    tpu.vector_store %arg4[%c0_34, %c0_35, %c208], %74 {strides = array<i32>} : memref<1x8x256xf32, #tpu.memory_space<vmem>>, vector<1x8x16xf32>,
    %75 = vector.extract_strided_slice %18 {offsets = [0, 252], sizes = [8, 16], strides = [1, 1]} : vector<8x288xf32> to vector<8x16xf32>
    %c0_36 = arith.constant 0 : index
    %c0_37 = arith.constant 0 : index
    %c224 = arith.constant 224 : index
    %76 = vector.load %arg4[%c0_36, %c0_37, %c224] : memref<1x8x256xf32, #tpu.memory_space<vmem>>, vector<1x8x16xf32>
    %77 = vector.shape_cast %76 : vector<1x8x16xf32> to vector<8x16xf32>
    %78 = vector.shape_cast %75 : vector<8x16xf32> to vector<1x8x16xf32>
    tpu.vector_store %arg4[%c0_36, %c0_37, %c224], %78 {strides = array<i32>} : memref<1x8x256xf32, #tpu.memory_space<vmem>>, vector<1x8x16xf32>,
    %79 = vector.extract_strided_slice %18 {offsets = [0, 270], sizes = [8, 16], strides = [1, 1]} : vector<8x288xf32> to vector<8x16xf32>
    %c0_38 = arith.constant 0 : index
    %c0_39 = arith.constant 0 : index
    %c240 = arith.constant 240 : index
    %80 = vector.load %arg4[%c0_38, %c0_39, %c240] : memref<1x8x256xf32, #tpu.memory_space<vmem>>, vector<1x8x16xf32>
    %81 = vector.shape_cast %80 : vector<1x8x16xf32> to vector<8x16xf32>
    %82 = vector.shape_cast %79 : vector<8x16xf32> to vector<1x8x16xf32>
    tpu.vector_store %arg4[%c0_38, %c0_39, %c240], %82 {strides = array<i32>} : memref<1x8x256xf32, #tpu.memory_space<vmem>>, vector<1x8x16xf32>,
    return
  }
  func.func @transform_0(%arg0: i32) -> (i32, i32, i32) {
    %c0_i32 = arith.constant 0 : i32
    %c0_i32_0 = arith.constant 0 : i32
    %c0_i32_1 = arith.constant 0 : i32
    return %arg0, %c0_i32, %c0_i32_0 : i32, i32, i32
  }
  func.func @transform_1(%arg0: i32) -> (i32, i32) {
    %c0_i32 = arith.constant 0 : i32
    %c0_i32_0 = arith.constant 0 : i32
    %c0_i32_1 = arith.constant 0 : i32
    return %c0_i32, %c0_i32_0 : i32, i32
  }
  func.func @transform_2(%arg0: i32) -> (i32, i32) {
    %c0_i32 = arith.constant 0 : i32
    %c0_i32_0 = arith.constant 0 : i32
    %c0_i32_1 = arith.constant 0 : i32
    return %c0_i32, %c0_i32_0 : i32, i32
  }
  func.func @transform_3(%arg0: i32) -> (i32, i32, i32) {
    %c0_i32 = arith.constant 0 : i32
    %c0_i32_0 = arith.constant 0 : i32
    %c0_i32_1 = arith.constant 0 : i32
    return %arg0, %c0_i32, %c0_i32_0 : i32, i32, i32
  }
}

</mosaic_0001>

<bundles_post_ra>
// kernel: conv2d_block_pallas.1
= control target key start
LH: loop header
LB: loop body
LE: loop exit
PB: predicated region body
PF: predicated region fallthrough
CT: control target
= control target key end

     0   :  { %s757_s12 = smov 0   ;;  %s826_s0 = inlined_call_operand.vmem [shape: f32[2,8,342], index: 0, kind: input, shape index: {}]   ;;  %s827_s1 = inlined_call_operand.vmem [shape: f32[8,72], index: 1, kind: input, shape index: {}]   ;;  %s828_s2 = inlined_call_operand.vmem [shape: f32[8,1], index: 2, kind: input, shape index: {}]   ;;  %s829_s3 = inlined_call_operand.vmem [shape: f32[2,8,256], index: 3, kind: output, shape index: {}]  }
   0x1 LB: > { %s563_s13 = sadd.s32 4294967295, %s711_s12   ;;  %p567_p0 = scmp.ge.s32.totalorder %s711_s12, 1  ;;  %s711_s12 = sphi %s757_s12, %s13_s12  }
   0x2   : > { %p137_p1 = scmp.lt.s32.totalorder %s711_s12, 3 }
   0x4   : > { %p138_p2 = pnand %p567_p0, %p137_p1 }
   0x5   : > { %p161_p3 = scmp.lt.s32.totalorder (!%p138_p2), %s563_s13, 1  ;;  %v713_v0 = vmov (!%p138_p2), 0.0|0.0   ;;  %s714_s18 = smov (!%p138_p2), 126   ;;  %v719_v5 = vmov (!%p138_p2), 0.0   ;;  %vm720_vm0 = vmmov (!%p138_p2), 0   ;;  %v723_v6 = vmov (!%p138_p2), 0  }
   0x6   : > { %141 = sbr.rel (%p138_p2) target bundleno = 530 (0x212), region = 32  ;;  %623 = vmatprep.subr.bf16.mxu1 (!%p138_p2), %v713_v0  ;;  %s715_s19 = smov (!%p138_p2), 127   ;;  %348 = vmatprep.mubr.f32.mxu0 (!%p138_p2), %v719_v5  ;;  %v172_v7 = vld [vmem:[%s828_s2] sm:$0xff] (!%p138_p2)  ;;  %vm185_vm1 = vcmask (!%p138_p2), 1039360   ;;  %vm209_vm2 = vcmask (!%p138_p2), 900096   ;;  %vm197_vm3 = vcmask (!%p138_p2), 1031168  }
   0x7   : > { %s716_s20 = smov (!%p138_p2), 110   ;;  %s717_s21 = smov (!%p138_p2), 108   ;;  %604 = vmatprep.mubr.msk.f32.mxu1 (!%p138_p2), %vm720_vm0, %v719_v5  ;;  %703 = vset.pattern.permute.xlu1 (!%p138_p2), %v723_v6  ;;  %vm233_vm4 = vcmask (!%p138_p2), 883712   ;;  %vm221_vm5 = vcmask (!%p138_p2), 891904   ;;  %vm257_vm6 = vcmask (!%p138_p2), 744448   ;;  %vm245_vm7 = vcmask (!%p138_p2), 752640  }
   0x8   : > { %s718_s22 = smov (!%p138_p2), 109   ;;  %s721_s23 = smov (!%p138_p2), 91   ;;  %704 = vset.pattern.permute.xlu0 (!%p138_p2), %v723_v6  ;;  %vm269_vm8 = vcmask (!%p138_p2), 736256   ;;  %v171_v62 = vld [vmem:[%s827_s1] sm:$0xff] (!%p138_p2)  ;;  %vm280_vm9 = vcmask (!%p138_p2), 588800   ;;  %vm428_vm10 = vcmask (!%p138_p2), 130048  }
   0x9   : > { %s722_s24 = smov (!%p138_p2), 92   ;;  %s724_s25 = smov (!%p138_p2), 90   ;;  %vm434_vm11 = vcmask (!%p138_p2), 261248   ;;  %vm439_vm12 = vcmask (!%p138_p2), 392448   ;;  %vm444_vm13 = vcmask (!%p138_p2), 523648   ;;  %vm449_vm14 = vcmask (!%p138_p2), 654848  }
   0xa   : > { %s725_s4 = smov (!%p138_p2), 100   ;;  %s726_s8 = smov (!%p138_p2), 114   ;;  %vm454_vm15 = vcmask (!%p138_p2), 786048   ;;  %vm459_vm0 = vcmask (!%p138_p2), 917248  }
   0xb   : > { %s727_s9 = smov (!%p138_p2), 112   ;;  %s728_s10 = smov (!%p138_p2), 124  }
   0xc   : > { %s729_s11 = smov (!%p138_p2), 122   ;;  %s732_s15 = smov (!%p138_p2), 118  }
   0xd   : > { %s831_s13 = smov (!%p161_p3, %s563_s13), 1  ;;  %s733_s16 = smov 104  }
   0xe   : > { %s635_s14 = smul.u32 24, %s831_s13  ;;  %s575_s30 = sshll.u32 %s831_s13, 4 }
   0xf   : > { %s799_s7 = scalar_lea.vmem %s829_s3, %s575_s30  ;;  %s730_s13 = smov 120  }
  0x10   : > { %s165_s17 = scalar_lea.vmem %s826_s0, %s635_s14  ;;  %s731_s14 = smov 106  }
  0x11   : > { %v174_v1 = vld [vmem:[%s165_s17 + $0x8] sm:$0xff]  ;;  %v175_v2 = vld [vmem:[%s165_s17 + $0x10] sm:$0xff]  ;;  %v173_v4 = vld [vmem:[%s165_s17] sm:$0xff]  ;;  %s734_s17 = smov 116  }
  0x12   : > { %v673_v3 = vpack.i.bf16 %v175_v2, %v174_v1 }
  0x14   : > { %674 = vrot.lane.b32.xlu1 %v673_v3, %s714_s18  ;;  %669 = vrot.lane.b32.xlu0 %v673_v3, %s715_s19 }
  0x18   : > { %679 = vrot.lane.b32.xlu1 %v673_v3, %s716_s20  ;;  %179 = vrot.lane.b32.xlu0 %v173_v4, %s715_s19  ;;  %s736_s19 = smov 98  }
  0x1c   : > { %203 = vrot.lane.b32.xlu1 %v173_v4, %s716_s20  ;;  %191 = vrot.lane.b32.xlu0 %v173_v4, %s714_s18 }
  0x20   : > { %689 = vrot.lane.b32.xlu1 %v673_v3, %s717_s21  ;;  %684 = vrot.lane.b32.xlu0 %v673_v3, %s718_s22 }
  0x24   : > { %227 = vrot.lane.b32.xlu1 %v173_v4, %s717_s21  ;;  %215 = vrot.lane.b32.xlu0 %v173_v4, %s718_s22 }
  0x28   : > { %699 = vrot.lane.b32.xlu1 %v673_v3, %s721_s23  ;;  %694 = vrot.lane.b32.xlu0 %v673_v3, %s722_s24 }
  0x2c   : > { %251 = vrot.lane.b32.xlu1 %v173_v4, %s721_s23  ;;  %239 = vrot.lane.b32.xlu0 %v173_v4, %s722_s24 }
  0x30   : > { %267 = vrot.lane.b32.xlu1 %v175_v2, %s724_s25  ;;  %265 = vrot.lane.b32.xlu0 %v174_v1, %s724_s25 }
  0x34   : > { %263 = vrot.lane.b32.xlu0 %v173_v4, %s724_s25  ;;  %277 = vperm.xlu1 %703, %v172_v7  }
  0x86   : > { %v675_v8 = vpop.permute.xlu1 %674  ;;  %v670_v9 = vpop.permute.xlu0 %669 }
  0x87   : > { %v672_v10 = vunpack.i.h.bf16 %v670_v9  ;;  %v671_v11 = vunpack.i.l.bf16 %v670_v9  ;;  %v677_v12 = vunpack.i.h.bf16 %v675_v8  ;;  %v676_v13 = vunpack.i.l.bf16 %v675_v8 }
  0x89   : > { %v624_v14 = vpack.c.bf16 %v672_v10, %v175_v2  ;;  %v187_v15 = vsel %vm185_vm1, %v671_v11, %v672_v10  ;;  %v199_v24 = vsel %vm197_vm3, %v676_v13, %v677_v12 }
  0x8a   : > { %v680_v16 = vpop.permute.xlu1 %679  ;;  %v180_v17 = vpop.permute.xlu0 %179  ;;  %v607_v18 = vpack.c.bf16 %v187_v15, %v174_v1 }
  0x8b   : > { %v682_v19 = vunpack.i.h.bf16 %v680_v16  ;;  %v681_v20 = vunpack.i.l.bf16 %v680_v16  ;;  %v186_v21 = vsel %vm185_vm1, %v180_v17, %v671_v11  ;;  %625 = vmatpush3.bf16.msra.mxu1 %v624_v14  ;;  %vm500_vm1 = vcmask 818176  }
  0x8c   : > { %608 = vmatprep.subr.bf16.mxu0 %v607_v18  ;;  %626 = vmatprep.subr.bf16.mxu1 %v713_v0  ;;  %v609_v22 = vpack.c.bf16 %v186_v21, %v173_v4 }
  0x8d   : > { %v627_v23 = vpack.c.bf16 %v682_v19, %v677_v12  ;;  %v211_v25 = vsel %vm209_vm2, %v681_v20, %v682_v19 }
  0x8e   : > { %v204_v26 = vpop.permute.xlu1 %203  ;;  %610 = vmatpush1.bf16.msra.mxu0 %v609_v22  ;;  %v192_v27 = vpop.permute.xlu0 %191  ;;  %v611_v28 = vpack.c.bf16 %v211_v25, %v199_v24 }
  0x8f   : > { %v210_v29 = vsel %vm209_vm2, %v204_v26, %v681_v20  ;;  %v198_v30 = vsel %vm197_vm3, %v192_v27, %v676_v13  ;;  %628 = vmatpush3.bf16.msra.mxu1 %v627_v23  ;;  %vm469_vm2 = vcmask 1048448   ;;  %vm466_vm3 = vcmask 932864  }
  0x90   : > { %v613_v31 = vpack.c.bf16 %v210_v29, %v198_v30  ;;  %612 = vmatprep.subr.bf16.mxu0 %v611_v28  ;;  %629 = vmatprep.subr.bf16.mxu1 %v713_v0 }
  0x92   : > { %v690_v32 = vpop.permute.xlu1 %689  ;;  %614 = vmatpush1.bf16.msra.mxu0 %v613_v31  ;;  %v685_v33 = vpop.permute.xlu0 %684 }
  0x93   : > { %v692_v34 = vunpack.i.h.bf16 %v690_v32  ;;  %v691_v35 = vunpack.i.l.bf16 %v690_v32  ;;  %v687_v36 = vunpack.i.h.bf16 %v685_v33  ;;  %v686_v37 = vunpack.i.l.bf16 %v685_v33 }
  0x95   : > { %v630_v38 = vpack.c.bf16 %v692_v34, %v687_v36  ;;  %v223_v39 = vsel %vm221_vm5, %v686_v37, %v687_v36  ;;  %v235_v40 = vsel %vm233_vm4, %v691_v35, %v692_v34 }
  0x96   : > { %v228_v41 = vpop.permute.xlu1 %227  ;;  %v216_v42 = vpop.permute.xlu0 %215  ;;  %v615_v43 = vpack.c.bf16 %v235_v40, %v223_v39 }
  0x97   : > { %v234_v44 = vsel %vm233_vm4, %v228_v41, %v691_v35  ;;  %v222_v45 = vsel %vm221_vm5, %v216_v42, %v686_v37  ;;  %631 = vmatpush3.bf16.msra.mxu1 %v630_v38 }
  0x98   : > { %v617_v46 = vpack.c.bf16 %v234_v44, %v222_v45  ;;  %616 = vmatprep.subr.bf16.mxu0 %v615_v43  ;;  %632 = vmatprep.subr.bf16.mxu1 %v713_v0 }
  0x9a   : > { %v700_v47 = vpop.permute.xlu1 %699  ;;  %v695_v48 = vpop.permute.xlu0 %694  ;;  %618 = vmatpush1.bf16.msra.mxu0 %v617_v46 }
  0x9b   : > { %v702_v49 = vunpack.i.h.bf16 %v700_v47  ;;  %v701_v50 = vunpack.i.l.bf16 %v700_v47  ;;  %v697_v51 = vunpack.i.h.bf16 %v695_v48  ;;  %v696_v52 = vunpack.i.l.bf16 %v695_v48 }
  0x9d   : > { %v633_v53 = vpack.c.bf16 %v702_v49, %v697_v51  ;;  %v247_v54 = vsel %vm245_vm7, %v696_v52, %v697_v51  ;;  %v259_v55 = vsel %vm257_vm6, %v701_v50, %v702_v49 }
  0x9e   : > { %v252_v56 = vpop.permute.xlu1 %251  ;;  %v240_v57 = vpop.permute.xlu0 %239  ;;  %v619_v58 = vpack.c.bf16 %v259_v55, %v247_v54 }
  0x9f   : > { %v258_v59 = vsel %vm257_vm6, %v252_v56, %v701_v50  ;;  %v246_v60 = vsel %vm245_vm7, %v240_v57, %v696_v52  ;;  %634 = vmatpush3.bf16.msra.mxu1 %v633_v53 }
  0xa0   : > { %v621_v61 = vpack.c.bf16 %v258_v59, %v246_v60  ;;  %620 = vmatprep.subr.bf16.mxu0 %v619_v58  ;;  %602 = vmatprep.subr.mxu1 %v719_v5 }
  0xa2   : > { %v268_v63 = vpop.permute.xlu1 %267  ;;  %v266_v0 = vpop.permute.xlu0 %265  ;;  %622 = vmatpush1.bf16.msra.mxu0 %v621_v61 }
  0xa3   : > { %v271_v1 = vsel %vm269_vm8, %v266_v0, %v268_v63  ;;  %603 = vmatpush3.msra.mxu1 %v268_v63 }
  0xa4   : > { %300 = vmatprep.subr.mxu0 %v271_v1  ;;  %605 = vmatmul.mubr.msk.f32.vlgmr.msra.gmra.mrb[0].mxu1 %vm280_vm9, %v171_v62 }
  0xa6   : > { %v264_v2 = vpop.permute.xlu0 %263 }
  0xa7   : > { %v270_v3 = vsel %vm269_vm8, %v264_v2, %v266_v0 }
  0xa8   : > { %301 = vmatpush1.msra.mxu0 %v270_v3 }
  0xa9   : > { %571 = vmatmul.mubr.msk.f32.vlgmr.msra.gmra.mrb[0].mxu0 %vm280_vm9, %v171_v62 }
  0xb3   : > { %v278_v4 = vpop.permute.xlu1 %277 }
 0x177   : > { %v421_v5 = vpop.f32.mrb[0].mxu1 }
 0x178   : > { %v422_v6 = vadd.f32 %v421_v5, %v278_v4  ;;  %v606_v7 = vpop.f32.mrb[1].mxu1 }
 0x17a   : > { %v427_v8 = vmax.f32 %v422_v6, 0.0 }
 0x17c   : > { %v350_v9 = vpop.f32.mrb[0].mxu0  ;;  %498 = vrot.lane.b32.xlu0 %v427_v8, %s725_s4 }
 0x17d   : > { %v351_v10 = vadd.f32 %v350_v9, %v278_v4  ;;  %v352_v11 = vpop.f32.mrb[1].mxu0 }
 0x17e   : > { %v353_v13 = vadd.f32 %v352_v11, %v278_v4 }
 0x17f   : > { %v425_v12 = vmax.f32 %v351_v10, 0.0 }
 0x180   : > { %v426_v14 = vmax.f32 %v353_v13, 0.0 }
 0x181   : > { %462 = vrot.lane.b32.xlu0 %v425_v12, %s726_s8  ;;  %431 = vrot.lane.b32.xlu1 %v425_v12, %s714_s18  ;;  %429 = vst.msk [vmem:[%s799_s7] sm:$0xff] %vm428_vm10, %v425_v12  ;;  %s735_s18 = smov 102  }
 0x185   : > { %471 = vrot.lane.b32.xlu0 %v426_v14, %s727_s9  ;;  %436 = vrot.lane.b32.xlu1 %v425_v12, %s728_s10 }
 0x189   : > { %475 = vrot.lane.b32.xlu0 %v426_v14, %s716_s20  ;;  %441 = vrot.lane.b32.xlu1 %v425_v12, %s729_s11 }
 0x18d   : > { %479 = vrot.lane.b32.xlu0 %v426_v14, %s717_s21  ;;  %446 = vrot.lane.b32.xlu1 %v425_v12, %s730_s13 }
 0x191   : > { %483 = vrot.lane.b32.xlu0 %v426_v14, %s731_s14  ;;  %451 = vrot.lane.b32.xlu1 %v425_v12, %s732_s15 }
 0x195   : > { %487 = vrot.lane.b32.xlu0 %v426_v14, %s733_s16  ;;  %456 = vrot.lane.b32.xlu1 %v425_v12, %s734_s17 }
 0x199   : > { %491 = vrot.lane.b32.xlu0 %v426_v14, %s735_s18  ;;  %496 = vrot.lane.b32.xlu1 %v426_v14, %s725_s4 }
 0x19d   : > { %504 = vrot.lane.b32.xlu0 %v427_v8, %s736_s19  ;;  %464 = vrot.lane.b32.xlu1 %v426_v14, %s726_s8 }
 0x1ee   : > { %v499_v15 = vpop.permute.xlu0 %498 }
 0x1f3   : > { %v463_v16 = vpop.permute.xlu0 %462  ;;  %v432_v17 = vpop.permute.xlu1 %431 }
 0x1f4   : > { %435 = vst.msk [vmem:[%s799_s7] sm:$0xff] %vm434_vm11, %v432_v17 }
 0x1f7   : > { %v472_v18 = vpop.permute.xlu0 %471  ;;  %v437_v19 = vpop.permute.xlu1 %436 }
 0x1f8   : > { %474 = vst.msk [vmem:[%s799_s7 + $0x8] sm:$0xff] %vm428_vm10, %v472_v18 }
 0x1f9   : > { %440 = vst.msk [vmem:[%s799_s7] sm:$0xff] %vm439_vm12, %v437_v19 }
 0x1fb   : > { %v476_v20 = vpop.permute.xlu0 %475  ;;  %v442_v21 = vpop.permute.xlu1 %441 }
 0x1fc   : > { %478 = vst.msk [vmem:[%s799_s7 + $0x8] sm:$0xff] %vm434_vm11, %v476_v20 }
 0x1fd   : > { %445 = vst.msk [vmem:[%s799_s7] sm:$0xff] %vm444_vm13, %v442_v21 }
 0x1ff   : > { %v480_v22 = vpop.permute.xlu0 %479  ;;  %v447_v23 = vpop.permute.xlu1 %446 }
 0x200   : > { %482 = vst.msk [vmem:[%s799_s7 + $0x8] sm:$0xff] %vm439_vm12, %v480_v22 }
 0x201   : > { %450 = vst.msk [vmem:[%s799_s7] sm:$0xff] %vm449_vm14, %v447_v23 }
 0x203   : > { %v484_v24 = vpop.permute.xlu0 %483  ;;  %v452_v25 = vpop.permute.xlu1 %451 }
 0x204   : > { %486 = vst.msk [vmem:[%s799_s7 + $0x8] sm:$0xff] %vm444_vm13, %v484_v24 }
 0x205   : > { %455 = vst.msk [vmem:[%s799_s7] sm:$0xff] %vm454_vm15, %v452_v25 }
 0x207   : > { %v488_v26 = vpop.permute.xlu0 %487  ;;  %v457_v27 = vpop.permute.xlu1 %456 }
 0x208   : > { %490 = vst.msk [vmem:[%s799_s7 + $0x8] sm:$0xff] %vm449_vm14, %v488_v26 }
 0x209   : > { %460 = vst.msk [vmem:[%s799_s7] sm:$0xff] %vm459_vm0, %v457_v27 }
 0x20b   : > { %v492_v28 = vpop.permute.xlu0 %491  ;;  %v497_v29 = vpop.permute.xlu1 %496 }
 0x20c   : > { %494 = vst.msk [vmem:[%s799_s7 + $0x8] sm:$0xff] %vm454_vm15, %v492_v28  ;;  %v501_v30 = vsel %vm500_vm1, %v497_v29, %v499_v15 }
 0x20d   : > { %503 = vst.msk [vmem:[%s799_s7 + $0x8] sm:$0xff] %vm459_vm0, %v501_v30 }
 0x20f   : > { %v505_v31 = vpop.permute.xlu0 %504  ;;  %v465_v32 = vpop.permute.xlu1 %464 }
 0x210   : > { %507 = vst.msk [vmem:[%s799_s7 + $0x8] sm:$0xff] %vm469_vm2, %v505_v31  ;;  %v467_v33 = vsel %vm466_vm3, %v463_v16, %v465_v32 }
 0x211   : > { %470 = vst.msk [vmem:[%s799_s7] sm:$0xff] %vm469_vm2, %v467_v33 }
 0x212 PF: > { %s13_s12 = sadd.s32 1, %s711_s12  }
 0x213   : > { %p10_p4 = scmp.ge.s32.totalorder %s13_s12, 4  }
 0x215   :  { %12 = sbr.rel (!%p10_p4) target bundleno = 1 (0x1), region = 62 }

</bundles_post_ra>
